<compile_context>
chip_gen: v7x
topology: tpu7x:2x2x1
jax: 0.10.0
libtpu: 0.0.40
codegen_flags: <defaults>
</compile_context>

<pallas_src>
import jax
import jax.numpy as jnp
from jax.experimental import pallas as pl
from jax.experimental.pallas import tpu as pltpu

_LANE = 128


# ----------------------------------------------------------------------------
# Pallas kernel
# ----------------------------------------------------------------------------

def _highpass_kernel(x_main_ref, x_halo0_ref, x_halo1_ref, o_ref):
    """Channels-last blocks (N*C on the lane axis):
         x_main_ref : (TH, W+2, TL)  padded input rows [i*TH, i*TH+TH)
         x_halo0_ref: (1,  W+2, TL)  padded input row   i*TH+TH
         x_halo1_ref: (1,  W+2, TL)  padded input row   i*TH+TH+1
         o_ref      : (TH, W,   TL)  output rows        [i*TH, i*TH+TH)
    """
    th, w, _ = o_ref.shape
    # Leading-dim concat is cheap (no lane/sublane shuffles); upcast to f32 so
    # bf16 inputs still compute in f32 in-register.
    x = jnp.concatenate(
        [x_main_ref[...], x_halo0_ref[...], x_halo1_ref[...]], axis=0
    ).astype(jnp.float32)                                    # (TH+2, W+2, TL)

    # Separable 3x3 box sum: horizontal pass (only 2 shifted W-views), then a
    # vertical pass over the leading dim (free row slices).
    s = x[:, 0:w, :] + x[:, 1:w + 1, :] + x[:, 2:w + 2, :]   # (TH+2, W, TL)
    box = s[0:th] + s[1:th + 1] + s[2:th + 2]                # (TH,   W, TL)
    center = x[1:th + 1, 1:w + 1, :]

    # [[-1,-1,-1],[-1,8,-1],[-1,-1,-1]]  ==  9*x - box3x3(x)
    o_ref[...] = (9.0 * center - box).astype(o_ref.dtype)


# ----------------------------------------------------------------------------
# Tile / VMEM sizing helpers
# ----------------------------------------------------------------------------

def _vmem_capacity_bytes():
    try:
        cap = getattr(pltpu.get_tpu_info(), "vmem_capacity_bytes", None)
        if cap:
            return int(cap)
    except Exception:
        pass
    return 64 * 1024 * 1024  # v7x worst case


def _step_bytes(th, tl, w):
    # f32 upper bound for one pipeline step: main input + 2 halo rows + output.
    wp = w + 2
    return 4 * tl * (th * wp + 2 * wp + th * w)


def _choose_tiles(h, w, ncp_est, step_budget):
    # Lane tile: a few vregs wide; shrink (multiples of 128) if even a minimal
    # 8-row H tile would not fit the per-step budget.
    tl = min(ncp_est, 4 * _LANE)
    th_min = min(h, 8)
    while tl > _LANE and _step_bytes(th_min, tl, w) > step_budget:
        tl -= _LANE
    # H tile: grow in 8-row steps while the block stays inside the budget.
    th = th_min
    while th < h and _step_bytes(min(h, th + 8), tl, w) <= step_budget:
        th = min(h, th + 8)
    return th, tl


# ----------------------------------------------------------------------------
# Wrapper
# ----------------------------------------------------------------------------

def highpass(x):
    """x: (N, C, H, W) -> depthwise 3x3 high-pass, zero padding = 1."""
    n, c, h, w = x.shape
    nc = n * c

    vmem_cap = _vmem_capacity_bytes()
    step_budget = min(24 * 1024 * 1024, vmem_cap // 5)

    ncp_est = -(-nc // _LANE) * _LANE
    th, tl = _choose_tiles(h, w, ncp_est, step_budget)
    ncp = -(-nc // tl) * tl          # lane pad so TL divides it exactly
    hpad = -(-h // th) * th          # H pad so TH divides it exactly
    wp = w + 2

    # Channels-last relayout: N*C -> lane axis (dense, unmasked vector
    # loads/stores even for tiny W).  Zero border + lane pad + H-tile pad are
    # fused into this one relayout copy.
    xt = jnp.transpose(x.reshape(nc, h, w), (1, 2, 0))              # (H, W, NC)
    xp = jnp.pad(xt, ((1, hpad - h + 1), (1, 1), (0, ncp - nc)))    # (Hpad+2, W+2, NCP)

    grid = (hpad // th, ncp // tl)
    sb = _step_bytes(th, tl, w)
    vmem_limit = int(min(int(vmem_cap * 0.9), max(16 * 1024 * 1024, 4 * sb)))

    out = pl.pallas_call(
        _highpass_kernel,
        out_shape=jax.ShapeDtypeStruct((hpad, w, ncp), x.dtype),
        grid=grid,
        in_specs=[
            # main rows of this H tile
            pl.BlockSpec((th, wp, tl), lambda i, j: (i, 0, j)),
            # two halo rows below the tile (block size 1 => block idx == row idx)
            pl.BlockSpec((1, wp, tl), lambda i, j, _t=th: (i * _t + _t, 0, j)),
            pl.BlockSpec((1, wp, tl), lambda i, j, _t=th: (i * _t + _t + 1, 0, j)),
        ],
        out_specs=pl.BlockSpec((th, w, tl), lambda i, j: (i, 0, j)),
        compiler_params=pltpu.CompilerParams(
            dimension_semantics=("parallel", "parallel"),
            vmem_limit_bytes=vmem_limit),
    )(xp, xp, xp)

    y = out[:h, :, :nc]                                   # drop H / lane padding
    return jnp.transpose(y, (2, 0, 1)).reshape(n, c, h, w)


# ----------------------------------------------------------------------------
# Main
# ----------------------------------------------------------------------------

if __name__ == "__main__":
    key = jax.random.PRNGKey(0)
    N, C, H, W = 2, 4, 16, 16
    x = jax.random.normal(key, (N, C, H, W), jnp.float32)

    out = jax.jit(highpass)(x)
    out = jax.block_until_ready(out)
    assert out.shape == (N, C, H, W), out.shape
    assert bool(jnp.all(jnp.isfinite(out)))

    # Reference: depthwise conv with the same fixed filter (matches
    # F.conv2d(x, filter.repeat(C,1,1,1), padding=1, groups=C)).
    filt = jnp.array([[-1., -1., -1.], [-1., 8., -1.], [-1., -1., -1.]],
                     jnp.float32)
    w_dw = jnp.tile(filt[None, None], (C, 1, 1, 1))          # (C,1,3,3) OIHW
    ref = jax.lax.conv_general_dilated(
        x, w_dw, window_strides=(1, 1), padding=((1, 1), (1, 1)),
        dimension_numbers=("NCHW", "OIHW", "NCHW"), feature_group_count=C)
    assert bool(jnp.allclose(out, ref, atol=1e-4, rtol=1e-4)), \
        float(jnp.max(jnp.abs(out - ref)))

    print("KERNEL_OK")
</pallas_src>

<mosaic_0001>
module attributes {stable_mosaic.version = 11 : i64} {
  func.func @_highpass_kernel(%arg0: i32, %arg1: i32, %arg2: memref<16x18x128xf32, #tpu.memory_space<vmem>>, %arg3: memref<1x18x128xf32, #tpu.memory_space<vmem>>, %arg4: memref<1x18x128xf32, #tpu.memory_space<vmem>>, %arg5: memref<16x16x128xf32, #tpu.memory_space<vmem>>) attributes {dimension_semantics = [#tpu.dimension_semantics<parallel>, #tpu.dimension_semantics<parallel>], iteration_bounds = array<i64: 1, 1>, scalar_prefetch = 0 : i64, scratch_operands = 0 : i64, tpu.core_type = #tpu.core_type<tc>, window_params = [{transform_indices = @transform_0, window_bounds = array<i64: 16, 18, 128>}, {transform_indices = @transform_1, window_bounds = array<i64: 1, 18, 128>}, {transform_indices = @transform_2, window_bounds = array<i64: 1, 18, 128>}, {transform_indices = @transform_3, window_bounds = array<i64: 16, 16, 128>}]} {
    %c0 = arith.constant 0 : index
    %c0_0 = arith.constant 0 : index
    %c0_1 = arith.constant 0 : index
    %0 = vector.load %arg2[%c0, %c0_0, %c0_1] : memref<16x18x128xf32, #tpu.memory_space<vmem>>, vector<16x18x128xf32>
    %c0_2 = arith.constant 0 : index
    %c0_3 = arith.constant 0 : index
    %c0_4 = arith.constant 0 : index
    %1 = vector.load %arg3[%c0_2, %c0_3, %c0_4] : memref<1x18x128xf32, #tpu.memory_space<vmem>>, vector<1x18x128xf32>
    %c0_5 = arith.constant 0 : index
    %c0_6 = arith.constant 0 : index
    %c0_7 = arith.constant 0 : index
    %2 = vector.load %arg4[%c0_5, %c0_6, %c0_7] : memref<1x18x128xf32, #tpu.memory_space<vmem>>, vector<1x18x128xf32>
    %3 = tpu.concatenate %0, %1, %2 in 0 : vector<16x18x128xf32>, vector<1x18x128xf32>, vector<1x18x128xf32> -> vector<18x18x128xf32>
    %4 = vector.extract_strided_slice %3 {offsets = [0, 0, 0], sizes = [18, 16, 128], strides = [1, 1, 1]} : vector<18x18x128xf32> to vector<18x16x128xf32>
    %5 = vector.extract_strided_slice %3 {offsets = [0, 1, 0], sizes = [18, 16, 128], strides = [1, 1, 1]} : vector<18x18x128xf32> to vector<18x16x128xf32>
    %6 = arith.addf %4, %5 : vector<18x16x128xf32>
    %7 = vector.extract_strided_slice %3 {offsets = [0, 2, 0], sizes = [18, 16, 128], strides = [1, 1, 1]} : vector<18x18x128xf32> to vector<18x16x128xf32>
    %8 = arith.addf %6, %7 : vector<18x16x128xf32>
    %9 = vector.extract_strided_slice %8 {offsets = [0, 0, 0], sizes = [16, 16, 128], strides = [1, 1, 1]} : vector<18x16x128xf32> to vector<16x16x128xf32>
    %10 = vector.extract_strided_slice %8 {offsets = [1, 0, 0], sizes = [16, 16, 128], strides = [1, 1, 1]} : vector<18x16x128xf32> to vector<16x16x128xf32>
    %11 = arith.addf %9, %10 : vector<16x16x128xf32>
    %12 = vector.extract_strided_slice %8 {offsets = [2, 0, 0], sizes = [16, 16, 128], strides = [1, 1, 1]} : vector<18x16x128xf32> to vector<16x16x128xf32>
    %13 = arith.addf %11, %12 : vector<16x16x128xf32>
    %14 = vector.extract_strided_slice %3 {offsets = [1, 1, 0], sizes = [16, 16, 128], strides = [1, 1, 1]} : vector<18x18x128xf32> to vector<16x16x128xf32>
    %cst = arith.constant 9.000000e+00 : f32
    %15 = vector.broadcast %cst : f32 to vector<16x16x128xf32>
    %16 = arith.mulf %15, %14 : vector<16x16x128xf32>
    %17 = arith.subf %16, %13 : vector<16x16x128xf32>
    %c0_8 = arith.constant 0 : index
    %c0_9 = arith.constant 0 : index
    %c0_10 = arith.constant 0 : index
    %18 = vector.load %arg5[%c0_8, %c0_9, %c0_10] : memref<16x16x128xf32, #tpu.memory_space<vmem>>, vector<16x16x128xf32>
    tpu.vector_store %arg5[%c0_8, %c0_9, %c0_10], %17 {strides = array<i32>} : memref<16x16x128xf32, #tpu.memory_space<vmem>>, vector<16x16x128xf32>,
    return
  }
  func.func @transform_0(%arg0: i32, %arg1: i32) -> (i32, i32, i32) {
    %c0_i32 = arith.constant 0 : i32
    %c0_i32_0 = arith.constant 0 : i32
    return %arg0, %c0_i32, %arg1 : i32, i32, i32
  }
  func.func @transform_1(%arg0: i32, %arg1: i32) -> (i32, i32, i32) {
    %c16_i32 = arith.constant 16 : i32
    %0 = arith.muli %arg0, %c16_i32 : i32
    %c16_i32_0 = arith.constant 16 : i32
    %1 = arith.addi %0, %c16_i32_0 : i32
    %c0_i32 = arith.constant 0 : i32
    %c0_i32_1 = arith.constant 0 : i32
    return %1, %c0_i32, %arg1 : i32, i32, i32
  }
  func.func @transform_2(%arg0: i32, %arg1: i32) -> (i32, i32, i32) {
    %c16_i32 = arith.constant 16 : i32
    %0 = arith.muli %arg0, %c16_i32 : i32
    %c16_i32_0 = arith.constant 16 : i32
    %1 = arith.addi %0, %c16_i32_0 : i32
    %c1_i32 = arith.constant 1 : i32
    %2 = arith.addi %1, %c1_i32 : i32
    %c0_i32 = arith.constant 0 : i32
    %c0_i32_1 = arith.constant 0 : i32
    return %2, %c0_i32, %arg1 : i32, i32, i32
  }
  func.func @transform_3(%arg0: i32, %arg1: i32) -> (i32, i32, i32) {
    %c0_i32 = arith.constant 0 : i32
    %c0_i32_0 = arith.constant 0 : i32
    return %arg0, %c0_i32, %arg1 : i32, i32, i32
  }
}

</mosaic_0001>

<bundles_post_ra>
// kernel: highpass.1
= control target key start
LH: loop header
LB: loop body
LE: loop exit
PB: predicated region body
PF: predicated region fallthrough
CT: control target
= control target key end

     0   :  { %vm172_vm0 = vcmask 1046528   ;;  %vm335_vm1 = vcmask 1045504   ;;  %vm642_vm2 = vcmask 1040384   ;;  %s1514_s0 = inlined_call_operand.vmem [shape: f32[18,18,128], index: 0, kind: input, shape index: {}, may-alias: {0,1,2}]   ;;  %s1515_s3 = inlined_call_operand.vmem [shape: f32[16,16,128], index: 3, kind: output, shape index: {}]   ;;  %s1516_s1 = inlined_call_operand.vmem [shape: f32[18,18,128], index: 1, kind: input, shape index: {}, may-alias: {0,1,2}]   ;;  %s1517_s2 = inlined_call_operand.vmem [shape: f32[18,18,128], index: 2, kind: input, shape index: {}, may-alias: {0,1,2}]  }
   0x1   :  { %v64_v0 = vld [vmem:[%s1514_s0] sm:$0xff]  ;;  %v65_v1 = vld [vmem:[%s1514_s0 + $0x8] sm:$0xff]  ;;  %v67_v2 = vld [vmem:[%s1514_s0 + $0x18] sm:$0xff] }
   0x2   :  { %v68_v3 = vld [vmem:[%s1514_s0 + $0x20] sm:$0xff]  ;;  %v892_v4 = vld [vmem:[%s1514_s0 + $0x30] sm:$0xff]  ;;  %v897_v5 = vld [vmem:[%s1514_s0 + $0x38] sm:$0xff]  ;;  %v173_v6 = vrot.slane %v64_v0, 1  ;;  %v174_v7 = vrot.slane %v65_v1, 1  ;;  %v178_v8 = vrot.slane %v67_v2, 1 }
   0x3   :  { %v179_v9 = vrot.slane %v68_v3, 1  ;;  %v183_v10 = vrot.slane %v892_v4, 1  ;;  %v184_v11 = vrot.slane %v897_v5, 1  ;;  %v336_v12 = vrot.slane %v64_v0, 2  ;;  %v66_v17 = vld [vmem:[%s1514_s0 + $0x10] sm:$0x3] }
   0x4   :  { %v175_v13 = vsel %vm172_vm0, %v173_v6, %v174_v7  ;;  %v337_v14 = vrot.slane %v65_v1, 2  ;;  %v341_v15 = vrot.slane %v67_v2, 2  ;;  %v342_v16 = vrot.slane %v68_v3, 2  ;;  %v69_v22 = vld [vmem:[%s1514_s0 + $0x28] sm:$0x3]  ;;  %v74_v48 = vld [vmem:[%s1514_s0 + $0x50] sm:$0xff] }
   0x5   :  { %v180_v18 = vsel %vm172_vm0, %v178_v8, %v179_v9  ;;  %v185_v19 = vsel %vm172_vm0, %v183_v10, %v184_v11  ;;  %v299_v20 = vadd.f32 %v175_v13, %v64_v0  ;;  %v346_v21 = vrot.slane %v892_v4, 2  ;;  %v914_v23 = vld [vmem:[%s1514_s0 + $0x40] sm:$0x3]  ;;  %v73_v47 = vld [vmem:[%s1514_s0 + $0x48] sm:$0xff]  ;;  %v939_v57 = vld [vmem:[%s1514_s0 + $0x58] sm:$0x3] }
   0x6   :  { %v301_v24 = vadd.f32 %v180_v18, %v67_v2  ;;  %v303_v25 = vadd.f32 %v185_v19, %v892_v4  ;;  %v338_v26 = vsel %vm335_vm1, %v336_v12, %v337_v14  ;;  %v343_v27 = vsel %vm335_vm1, %v341_v15, %v342_v16  ;;  %v947_v8 = vld [vmem:[%s1514_s0 + $0x60] sm:$0xff]  ;;  %v954_v13 = vld [vmem:[%s1514_s0 + $0x68] sm:$0xff] }
   0x7   :  { %v347_v28 = vrot.slane %v897_v5, 2  ;;  %v462_v29 = vadd.f32 %v338_v26, %v299_v20  ;;  %v176_v30 = vrot.slane %v66_v17, 1  ;;  %v181_v32 = vrot.slane %v69_v22, 1  ;;  %v970_v26 = vld [vmem:[%s1514_s0 + $0x70] sm:$0x3] }
   0x8   :  { %v464_v31 = vadd.f32 %v343_v27, %v301_v24  ;;  %v186_v33 = vrot.slane %v914_v23, 1  ;;  %v339_v34 = vrot.slane %v66_v17, 2  ;;  %v344_v37 = vrot.slane %v69_v22, 2 }
   0x9   :  { %v348_v35 = vsel %vm335_vm1, %v346_v21, %v347_v28  ;;  %v177_v36 = vsel %vm172_vm0, %v174_v7, %v176_v30  ;;  %v349_v38 = vrot.slane %v914_v23, 2  ;;  %v182_v41 = vsel %vm172_vm0, %v179_v9, %v181_v32 }
   0xa   :  { %v466_v39 = vadd.f32 %v348_v35, %v303_v25  ;;  %v498_v40 = vadd.f32 %v464_v31, %v462_v29  ;;  %v187_v42 = vsel %vm172_vm0, %v184_v11, %v186_v33  ;;  %v300_v43 = vadd.f32 %v177_v36, %v65_v1 }
   0xb   :  { %v302_v44 = vadd.f32 %v182_v41, %v68_v3  ;;  %v304_v45 = vadd.f32 %v187_v42, %v897_v5  ;;  %v340_v46 = vsel %vm335_vm1, %v337_v14, %v339_v34  ;;  %v562_v50 = vmul.f32 9.0, %v67_v2 }
   0xc   :  { %v530_v49 = vadd.f32 %v498_v40, %v466_v39  ;;  %v345_v51 = vsel %vm335_vm1, %v342_v16, %v344_v37  ;;  %v350_v52 = vsel %vm335_vm1, %v347_v28, %v349_v38  ;;  %v463_v53 = vadd.f32 %v340_v46, %v300_v43  ;;  %v983_v37 = vld [vmem:[%s1514_s0 + $0x78] sm:$0xff]  ;;  %v988_v38 = vld [vmem:[%s1514_s0 + $0x80] sm:$0xff] }
   0xd   :  { %v465_v54 = vadd.f32 %v345_v51, %v302_v44  ;;  %v467_v55 = vadd.f32 %v350_v52, %v304_v45  ;;  %v563_v56 = vmul.f32 9.0, %v68_v3  ;;  %v188_v59 = vrot.slane %v73_v47, 1 }
   0xe   :  { %v643_v58 = vrot.slane %v530_v49, 7  ;;  %v189_v60 = vrot.slane %v74_v48, 1  ;;  %v351_v61 = vrot.slane %v73_v47, 2  ;;  %v564_v63 = vmul.f32 9.0, %v69_v22 }
   0xf   :  { %v499_v62 = vadd.f32 %v465_v54, %v463_v53  ;;  %v352_v0 = vrot.slane %v74_v48, 2  ;;  %v500_v1 = vadd.f32 %v466_v39, %v464_v31  ;;  %v191_v7 = vrot.slane %v939_v57, 1 }
  0x10   :  { %v739_v2 = vsub.f32 %v562_v50, %v643_v58  ;;  %v190_v6 = vsel %vm172_vm0, %v188_v59, %v189_v60  ;;  %v354_v3 = vrot.slane %v939_v57, 2  ;;  %v565_v12 = vmul.f32 9.0, %v892_v4 }
  0x11   :  { %v531_v9 = vadd.f32 %v499_v62, %v467_v55  ;;  %v305_v10 = vadd.f32 %v190_v6, %v73_v47  ;;  %v353_v11 = vsel %vm335_vm1, %v351_v61, %v352_v0  ;;  %v192_v14 = vsel %vm172_vm0, %v189_v60, %v191_v7 }
  0x12   :  { %787 = vst [vmem:[%s1515_s3 - $0x1] sm:$0xfe] %v739_v2  ;;  %v355_v15 = vsel %vm335_vm1, %v352_v0, %v354_v3  ;;  %v501_v16 = vadd.f32 %v467_v55, %v465_v54  ;;  %v566_v17 = vmul.f32 9.0, %v897_v5  ;;  %v306_v20 = vadd.f32 %v192_v14, %v74_v48  ;;  %v1025_v3 = vld [vmem:[%s1514_s0 + $0x90] sm:$0xff] }
  0x13   :  { %v644_v18 = vrot.slane %v531_v9, 7  ;;  %v468_v19 = vadd.f32 %v353_v11, %v305_v10  ;;  %v193_v4 = vrot.slane %v947_v8, 1  ;;  %v567_v21 = vmul.f32 9.0, %v914_v23 }
  0x14   :  { %v194_v22 = vrot.slane %v954_v13, 1  ;;  %v356_v24 = vrot.slane %v947_v8, 2  ;;  %v357_v25 = vrot.slane %v954_v13, 2  ;;  %v469_v29 = vadd.f32 %v355_v15, %v306_v20 }
  0x15   :  { %v645_v5 = vsel %vm642_vm2, %v643_v58, %v644_v18  ;;  %v741_v27 = vsub.f32 %v564_v63, %v644_v18  ;;  %v532_v28 = vadd.f32 %v500_v1, %v468_v19  ;;  %v502_v32 = vadd.f32 %v468_v19, %v466_v39 }
  0x16   :  { %v740_v30 = vsub.f32 %v563_v56, %v645_v5  ;;  %v195_v31 = vsel %vm172_vm0, %v193_v4, %v194_v22  ;;  %v358_v23 = vsel %vm335_vm1, %v356_v24, %v357_v25  ;;  %v533_v34 = vadd.f32 %v501_v16, %v469_v29 }
  0x17   :  { %789 = vst [vmem:[%s1515_s3 + $0xf] sm:$0x1] %v741_v27  ;;  %v646_v33 = vrot.slane %v532_v28, 7  ;;  %v307_v35 = vadd.f32 %v195_v31, %v947_v8  ;;  %v196_v36 = vrot.slane %v970_v26, 1  ;;  %v568_v39 = vmul.f32 9.0, %v73_v47 }
  0x18   :  { %788 = vst [vmem:[%s1515_s3 + $0x7] sm:$0xff] %v740_v30  ;;  %v359_v40 = vrot.slane %v970_v26, 2  ;;  %v503_v41 = vadd.f32 %v469_v29, %v467_v55  ;;  %v569_v42 = vmul.f32 9.0, %v74_v48  ;;  %v647_v44 = vrot.slane %v533_v34, 7  ;;  %v1007_v55 = vld [vmem:[%s1514_s0 + $0x88] sm:$0x3] }
  0x19   :  { %v742_v43 = vsub.f32 %v565_v12, %v646_v33  ;;  %v470_v45 = vadd.f32 %v358_v23, %v307_v35  ;;  %v197_v46 = vsel %vm172_vm0, %v194_v22, %v196_v36  ;;  %v198_v51 = vrot.slane %v983_v37, 1  ;;  %v1070_v36 = vld [vmem:[%s1514_s0 + $0xb0] sm:$0xff] }
  0x1a   :  { %v308_v49 = vadd.f32 %v197_v46, %v954_v13  ;;  %v360_v50 = vsel %vm335_vm1, %v357_v25, %v359_v40  ;;  %v199_v52 = vrot.slane %v988_v38, 1  ;;  %v648_v47 = vsel %vm642_vm2, %v646_v33, %v647_v44 }
  0x1b   :  { %790 = vst [vmem:[%s1515_s3 + $0xf] sm:$0xfe] %v742_v43  ;;  %v744_v48 = vsub.f32 %v567_v21, %v647_v44  ;;  %v534_v53 = vadd.f32 %v502_v32, %v470_v45  ;;  %v361_v54 = vrot.slane %v983_v37, 2  ;;  %v743_v56 = vsub.f32 %v566_v17, %v648_v47  ;;  %v1060_v32 = vld [vmem:[%s1514_s0 + $0xa8] sm:$0xff] }
  0x1c   :  { %v471_v58 = vadd.f32 %v360_v50, %v308_v49  ;;  %v200_v59 = vsel %vm172_vm0, %v198_v51, %v199_v52  ;;  %v362_v60 = vrot.slane %v988_v38, 2  ;;  %v570_v62 = vmul.f32 9.0, %v939_v57  ;;  %v1030_v57 = vld [vmem:[%s1514_s0 + $0x98] sm:$0xff] }
  0x1d   :  { %792 = vst [vmem:[%s1515_s3 + $0x1f] sm:$0x1] %v744_v48  ;;  %v649_v61 = vrot.slane %v534_v53, 7  ;;  %v309_v63 = vadd.f32 %v200_v59, %v983_v37  ;;  %v504_v0 = vadd.f32 %v470_v45, %v468_v19  ;;  %791 = vst [vmem:[%s1515_s3 + $0x17] sm:$0xff] %v743_v56  ;;  %v201_v6 = vrot.slane %v1007_v55, 1 }
  0x1e   :  { %v535_v1 = vadd.f32 %v503_v41, %v471_v58  ;;  %v363_v2 = vsel %vm335_vm1, %v361_v54, %v362_v60  ;;  %v364_v7 = vrot.slane %v1007_v55, 2  ;;  %v571_v11 = vmul.f32 9.0, %v947_v8 }
  0x1f   :  { %v745_v9 = vsub.f32 %v568_v39, %v649_v61  ;;  %v472_v10 = vadd.f32 %v363_v2, %v309_v63  ;;  %v505_v12 = vadd.f32 %v471_v58, %v469_v29  ;;  %v202_v15 = vsel %vm172_vm0, %v199_v52, %v201_v6 }
  0x20   :  { %v650_v14 = vrot.slane %v535_v1, 7  ;;  %v365_v16 = vsel %vm335_vm1, %v362_v60, %v364_v7  ;;  %v572_v17 = vmul.f32 9.0, %v954_v13  ;;  %v310_v19 = vadd.f32 %v202_v15, %v988_v38  ;;  %v1048_v13 = vld [vmem:[%s1514_s0 + $0xa0] sm:$0x3]  ;;  %v1111_v7 = vld [vmem:[%s1514_s0 + $0xc8] sm:$0xff] }
  0x21   :  { %793 = vst [vmem:[%s1515_s3 + $0x1f] sm:$0xfe] %v745_v9  ;;  %v536_v18 = vadd.f32 %v504_v0, %v472_v10  ;;  %v203_v20 = vrot.slane %v1025_v3, 1  ;;  %v204_v4 = vrot.slane %v1030_v57, 1  ;;  %v366_v22 = vrot.slane %v1025_v3, 2 }
  0x22   :  { %v651_v8 = vsel %vm642_vm2, %v649_v61, %v650_v14  ;;  %v747_v21 = vsub.f32 %v570_v62, %v650_v14  ;;  %v367_v24 = vrot.slane %v1030_v57, 2  ;;  %v473_v27 = vadd.f32 %v365_v16, %v310_v19 }
  0x23   :  { %v746_v25 = vsub.f32 %v569_v42, %v651_v8  ;;  %v652_v5 = vrot.slane %v536_v18, 7  ;;  %v205_v28 = vsel %vm172_vm0, %v203_v20, %v204_v4  ;;  %v573_v29 = vmul.f32 9.0, %v970_v26 }
  0x24   :  { %795 = vst [vmem:[%s1515_s3 + $0x2f] sm:$0x1] %v747_v21  ;;  %v311_v30 = vadd.f32 %v205_v28, %v1025_v3  ;;  %v368_v31 = vsel %vm335_vm1, %v366_v22, %v367_v24  ;;  %v506_v23 = vadd.f32 %v472_v10, %v470_v45  ;;  %v537_v34 = vadd.f32 %v505_v12, %v473_v27 }
  0x25   :  { %794 = vst [vmem:[%s1515_s3 + $0x27] sm:$0xff] %v746_v25  ;;  %v748_v33 = vsub.f32 %v571_v11, %v652_v5  ;;  %v206_v35 = vrot.slane %v1048_v13, 1  ;;  %v369_v26 = vrot.slane %v1048_v13, 2  ;;  %v574_v40 = vmul.f32 9.0, %v983_v37 }
  0x26   :  { %v474_v39 = vadd.f32 %v368_v31, %v311_v30  ;;  %v507_v41 = vadd.f32 %v473_v27, %v471_v58  ;;  %v575_v42 = vmul.f32 9.0, %v988_v38  ;;  %v653_v43 = vrot.slane %v537_v34, 7  ;;  %v1086_v38 = vld [vmem:[%s1514_s0 + $0xb8] sm:$0x3] }
  0x27   :  { %796 = vst [vmem:[%s1515_s3 + $0x2f] sm:$0xfe] %v748_v33  ;;  %v207_v44 = vsel %vm172_vm0, %v204_v4, %v206_v35  ;;  %v370_v45 = vsel %vm335_vm1, %v367_v24, %v369_v26  ;;  %v208_v46 = vrot.slane %v1060_v32, 1  ;;  %v209_v51 = vrot.slane %v1070_v36, 1 }
  0x28   :  { %v538_v49 = vadd.f32 %v506_v23, %v474_v39  ;;  %v312_v50 = vadd.f32 %v207_v44, %v1030_v57  ;;  %v371_v37 = vrot.slane %v1060_v32, 2  ;;  %v654_v52 = vsel %vm642_vm2, %v652_v5, %v653_v43  ;;  %v1146_v23 = vld [vmem:[%s1514_s0 + $0xe0] sm:$0xff] }
  0x29   :  { %v750_v47 = vsub.f32 %v573_v29, %v653_v43  ;;  %v576_v48 = vmul.f32 9.0, %v1007_v55  ;;  %v372_v53 = vrot.slane %v1070_v36, 2  ;;  %v749_v54 = vsub.f32 %v572_v17, %v654_v52  ;;  %v1101_v55 = vld [vmem:[%s1514_s0 + $0xc0] sm:$0xff] }
  0x2a   :  { %v655_v56 = vrot.slane %v538_v49, 7  ;;  %v475_v58 = vadd.f32 %v370_v45, %v312_v50  ;;  %v210_v59 = vsel %vm172_vm0, %v208_v46, %v209_v51  ;;  %v508_v62 = vadd.f32 %v474_v39, %v472_v10 }
  0x2b   :  { %798 = vst [vmem:[%s1515_s3 + $0x3f] sm:$0x1] %v750_v47  ;;  %v313_v60 = vadd.f32 %v210_v59, %v1060_v32  ;;  %v373_v61 = vsel %vm335_vm1, %v371_v37, %v372_v53  ;;  %v211_v63 = vrot.slane %v1086_v38, 1  ;;  %797 = vst [vmem:[%s1515_s3 + $0x37] sm:$0xff] %v749_v54  ;;  %v577_v2 = vmul.f32 9.0, %v1025_v3 }
  0x2c   :  { %v751_v0 = vsub.f32 %v574_v40, %v655_v56  ;;  %v539_v1 = vadd.f32 %v507_v41, %v475_v58  ;;  %v374_v6 = vrot.slane %v1086_v38, 2  ;;  %v509_v11 = vadd.f32 %v475_v58, %v473_v27 }
  0x2d   :  { %v476_v9 = vadd.f32 %v373_v61, %v313_v60  ;;  %v212_v10 = vsel %vm172_vm0, %v209_v51, %v211_v63  ;;  %v578_v12 = vmul.f32 9.0, %v1030_v57  ;;  %v213_v16 = vrot.slane %v1101_v55, 1  ;;  %v1127_v57 = vld [vmem:[%s1514_s0 + $0xd0] sm:$0x3] }
  0x2e   :  { %799 = vst [vmem:[%s1515_s3 + $0x3f] sm:$0xfe] %v751_v0  ;;  %v656_v14 = vrot.slane %v539_v1, 7  ;;  %v314_v3 = vadd.f32 %v212_v10, %v1070_v36  ;;  %v375_v15 = vsel %vm335_vm1, %v372_v53, %v374_v6  ;;  %v214_v18 = vrot.slane %v1111_v7, 1  ;;  %v1185_v63 = vld [vmem:[%s1514_s0 + $0xf0] sm:$0xff] }
  0x2f   :  { %v540_v17 = vadd.f32 %v508_v62, %v476_v9  ;;  %v376_v19 = vrot.slane %v1101_v55, 2  ;;  %v377_v20 = vrot.slane %v1111_v7, 2  ;;  %v579_v22 = vmul.f32 9.0, %v1048_v13  ;;  %v1141_v13 = vld [vmem:[%s1514_s0 + $0xd8] sm:$0xff] }
  0x30   :  { %v657_v4 = vsel %vm642_vm2, %v655_v56, %v656_v14  ;;  %v753_v8 = vsub.f32 %v576_v48, %v656_v14  ;;  %v477_v21 = vadd.f32 %v375_v15, %v314_v3  ;;  %v215_v5 = vsel %vm172_vm0, %v213_v16, %v214_v18 }
  0x31   :  { %v752_v24 = vsub.f32 %v575_v42, %v657_v4  ;;  %v658_v25 = vrot.slane %v540_v17, 7  ;;  %v378_v27 = vsel %vm335_vm1, %v376_v19, %v377_v20  ;;  %v315_v29 = vadd.f32 %v215_v5, %v1101_v55 }
  0x32   :  { %801 = vst [vmem:[%s1515_s3 + $0x4f] sm:$0x1] %v753_v8  ;;  %v541_v28 = vadd.f32 %v509_v11, %v477_v21  ;;  %v510_v30 = vadd.f32 %v476_v9, %v474_v39  ;;  %v216_v31 = vrot.slane %v1127_v57, 1  ;;  %v580_v34 = vmul.f32 9.0, %v1060_v32 }
  0x33   :  { %800 = vst [vmem:[%s1515_s3 + $0x47] sm:$0xff] %v752_v24  ;;  %v754_v33 = vsub.f32 %v577_v2, %v658_v25  ;;  %v379_v35 = vrot.slane %v1127_v57, 2  ;;  %v511_v26 = vadd.f32 %v477_v21, %v475_v58  ;;  %v478_v40 = vadd.f32 %v378_v27, %v315_v29  ;;  %v1220_v27 = vld [vmem:[%s1514_s0 + $0x108] sm:$0xff] }
  0x34   :  { %v659_v39 = vrot.slane %v541_v28, 7  ;;  %v217_v41 = vsel %vm172_vm0, %v214_v18, %v216_v31  ;;  %v581_v42 = vmul.f32 9.0, %v1070_v36  ;;  %v218_v45 = vrot.slane %v1141_v13, 1  ;;  %v1167_v36 = vld [vmem:[%s1514_s0 + $0xe8] sm:$0x3]  ;;  %v1230_v31 = vld [vmem:[%s1514_s0 + $0x110] sm:$0xff] }
  0x35   :  { %802 = vst [vmem:[%s1515_s3 + $0x4f] sm:$0xfe] %v754_v33  ;;  %v316_v43 = vadd.f32 %v217_v41, %v1111_v7  ;;  %v380_v44 = vsel %vm335_vm1, %v377_v20, %v379_v35  ;;  %v219_v32 = vrot.slane %v1146_v23, 1  ;;  %v542_v50 = vadd.f32 %v510_v30, %v478_v40 }
  0x36   :  { %v660_v46 = vsel %vm642_vm2, %v658_v25, %v659_v39  ;;  %v756_v49 = vsub.f32 %v579_v22, %v659_v39  ;;  %v381_v51 = vrot.slane %v1141_v13, 2  ;;  %v382_v48 = vrot.slane %v1146_v23, 2 }
  0x37   :  { %v755_v37 = vsub.f32 %v578_v12, %v660_v46  ;;  %v479_v52 = vadd.f32 %v380_v44, %v316_v43  ;;  %v220_v47 = vsel %vm172_vm0, %v218_v45, %v219_v32  ;;  %v661_v53 = vrot.slane %v542_v50, 7 }
  0x38   :  { %804 = vst [vmem:[%s1515_s3 + $0x5f] sm:$0x1] %v756_v49  ;;  %v582_v54 = vmul.f32 9.0, %v1086_v38  ;;  %v317_v56 = vadd.f32 %v220_v47, %v1141_v13  ;;  %v512_v58 = vadd.f32 %v478_v40, %v476_v9  ;;  %v383_v60 = vsel %vm335_vm1, %v381_v51, %v382_v48  ;;  %v1190_v38 = vld [vmem:[%s1514_s0 + $0xf8] sm:$0xff] }
  0x39   :  { %803 = vst [vmem:[%s1515_s3 + $0x57] sm:$0xff] %v755_v37  ;;  %v543_v59 = vadd.f32 %v511_v26, %v479_v52  ;;  %v221_v61 = vrot.slane %v1167_v36, 1  ;;  %v384_v62 = vrot.slane %v1167_v36, 2  ;;  %v757_v0 = vsub.f32 %v580_v34, %v661_v53 }
  0x3a   :  { %v480_v1 = vadd.f32 %v383_v60, %v317_v56  ;;  %v583_v2 = vmul.f32 9.0, %v1101_v55  ;;  %v513_v6 = vadd.f32 %v479_v52, %v477_v21  ;;  %v584_v12 = vmul.f32 9.0, %v1111_v7  ;;  %v1208_v7 = vld [vmem:[%s1514_s0 + $0x100] sm:$0x3] }
  0x3b   :  { %v662_v9 = vrot.slane %v543_v59, 7  ;;  %v222_v10 = vsel %vm172_vm0, %v219_v32, %v221_v61  ;;  %v385_v11 = vsel %vm335_vm1, %v382_v48, %v384_v62  ;;  %805 = vst [vmem:[%s1515_s3 + $0x5f] sm:$0xfe] %v757_v0  ;;  %v223_v15 = vrot.slane %v1185_v63, 1  ;;  %v1271_v62 = vld [vmem:[%s1514_s0 + $0x128] sm:$0xff] }
  0x3c   :  { %v544_v14 = vadd.f32 %v512_v58, %v480_v1  ;;  %v318_v3 = vadd.f32 %v222_v10, %v1146_v23  ;;  %v224_v16 = vrot.slane %v1190_v38, 1  ;;  %v386_v18 = vrot.slane %v1185_v63, 2 }
  0x3d   :  { %v663_v55 = vsel %vm642_vm2, %v661_v53, %v662_v9  ;;  %v759_v17 = vsub.f32 %v582_v54, %v662_v9  ;;  %v387_v19 = vrot.slane %v1190_v38, 2  ;;  %v585_v22 = vmul.f32 9.0, %v1127_v57 }
  0x3e   :  { %v758_v20 = vsub.f32 %v581_v42, %v663_v55  ;;  %v664_v4 = vrot.slane %v544_v14, 7  ;;  %v481_v8 = vadd.f32 %v385_v11, %v318_v3  ;;  %v225_v21 = vsel %vm172_vm0, %v223_v15, %v224_v16 }
  0x3f   :  { %807 = vst [vmem:[%s1515_s3 + $0x6f] sm:$0x1] %v759_v17  ;;  %v319_v24 = vadd.f32 %v225_v21, %v1185_v63  ;;  %v388_v25 = vsel %vm335_vm1, %v386_v18, %v387_v19  ;;  %v514_v5 = vadd.f32 %v480_v1, %v478_v40  ;;  %v226_v30 = vrot.slane %v1208_v7, 1 }
  0x40   :  { %806 = vst [vmem:[%s1515_s3 + $0x67] sm:$0xff] %v758_v20  ;;  %v760_v28 = vsub.f32 %v583_v2, %v664_v4  ;;  %v545_v29 = vadd.f32 %v513_v6, %v481_v8  ;;  %v389_v57 = vrot.slane %v1208_v7, 2  ;;  %v586_v34 = vmul.f32 9.0, %v1141_v13 }
  0x41   :  { %v482_v33 = vadd.f32 %v388_v25, %v319_v24  ;;  %v515_v35 = vadd.f32 %v481_v8, %v479_v52  ;;  %v587_v26 = vmul.f32 9.0, %v1146_v23  ;;  %v227_v40 = vsel %vm172_vm0, %v224_v16, %v226_v30  ;;  %v1246_v23 = vld [vmem:[%s1514_s0 + $0x118] sm:$0x3] }
  0x42   :  { %808 = vst [vmem:[%s1515_s3 + $0x6f] sm:$0xfe] %v760_v28  ;;  %v665_v39 = vrot.slane %v545_v29, 7  ;;  %v390_v41 = vsel %vm335_vm1, %v387_v19, %v389_v57  ;;  %v228_v42 = vrot.slane %v1220_v27, 1  ;;  %v320_v44 = vadd.f32 %v227_v40, %v1190_v38 }
  0x43   :  { %v546_v43 = vadd.f32 %v514_v5, %v482_v33  ;;  %v229_v45 = vrot.slane %v1230_v31, 1  ;;  %v391_v13 = vrot.slane %v1220_v27, 2  ;;  %v588_v49 = vmul.f32 9.0, %v1167_v36  ;;  %v1261_v36 = vld [vmem:[%s1514_s0 + $0x120] sm:$0xff] }
  0x44   :  { %v666_v32 = vsel %vm642_vm2, %v664_v4, %v665_v39  ;;  %v762_v46 = vsub.f32 %v585_v22, %v665_v39  ;;  %v392_v50 = vrot.slane %v1230_v31, 2  ;;  %v483_v52 = vadd.f32 %v390_v41, %v320_v44  ;;  %v1306_v5 = vld [vmem:[%s1514_s0 + $0x140] sm:$0xff] }
  0x45   :  { %v761_v51 = vsub.f32 %v584_v12, %v666_v32  ;;  %v667_v37 = vrot.slane %v546_v43, 7  ;;  %v230_v47 = vsel %vm172_vm0, %v228_v42, %v229_v45  ;;  %v516_v54 = vadd.f32 %v482_v33, %v480_v1 }
  0x46   :  { %810 = vst [vmem:[%s1515_s3 + $0x7f] sm:$0x1] %v762_v46  ;;  %v321_v48 = vadd.f32 %v230_v47, %v1220_v27  ;;  %v393_v53 = vsel %vm335_vm1, %v391_v13, %v392_v50  ;;  %v231_v56 = vrot.slane %v1246_v23, 1  ;;  %v547_v59 = vadd.f32 %v515_v35, %v483_v52 }
  0x47   :  { %809 = vst [vmem:[%s1515_s3 + $0x77] sm:$0xff] %v761_v51  ;;  %v763_v58 = vsub.f32 %v586_v34, %v667_v37  ;;  %v589_v60 = vmul.f32 9.0, %v1185_v63  ;;  %v394_v61 = vrot.slane %v1246_v23, 2  ;;  %v517_v2 = vadd.f32 %v483_v52, %v481_v8 }
  0x48   :  { %v484_v0 = vadd.f32 %v393_v53, %v321_v48  ;;  %v232_v1 = vsel %vm172_vm0, %v229_v45, %v231_v56  ;;  %v590_v6 = vmul.f32 9.0, %v1190_v38  ;;  %v668_v9 = vrot.slane %v547_v59, 7  ;;  %v1287_v38 = vld [vmem:[%s1514_s0 + $0x130] sm:$0x3] }
  0x49   :  { %811 = vst [vmem:[%s1515_s3 + $0x7f] sm:$0xfe] %v763_v58  ;;  %v322_v63 = vadd.f32 %v232_v1, %v1230_v31  ;;  %v395_v10 = vsel %vm335_vm1, %v392_v50, %v394_v61  ;;  %v233_v11 = vrot.slane %v1261_v36, 1  ;;  %v234_v14 = vrot.slane %v1271_v62, 1  ;;  %v1345_v56 = vld [vmem:[%s1514_s0 + $0x150] sm:$0xff] }
  0x4a   :  { %v548_v12 = vadd.f32 %v516_v54, %v484_v0  ;;  %v396_v3 = vrot.slane %v1261_v36, 2  ;;  %v397_v15 = vrot.slane %v1271_v62, 2  ;;  %v669_v16 = vsel %vm642_vm2, %v667_v37, %v668_v9 }
  0x4b   :  { %v765_v55 = vsub.f32 %v588_v49, %v668_v9  ;;  %v485_v17 = vadd.f32 %v395_v10, %v322_v63  ;;  %v591_v18 = vmul.f32 9.0, %v1208_v7  ;;  %v764_v19 = vsub.f32 %v587_v26, %v669_v16  ;;  %v1301_v7 = vld [vmem:[%s1514_s0 + $0x138] sm:$0xff] }
  0x4c   :  { %v670_v20 = vrot.slane %v548_v12, 7  ;;  %v235_v4 = vsel %vm172_vm0, %v233_v11, %v234_v14  ;;  %v398_v8 = vsel %vm335_vm1, %v396_v3, %v397_v15  ;;  %v518_v24 = vadd.f32 %v484_v0, %v482_v33 }
  0x4d   :  { %813 = vst [vmem:[%s1515_s3 + $0x8f] sm:$0x1] %v765_v55  ;;  %v549_v21 = vadd.f32 %v517_v2, %v485_v17  ;;  %v323_v22 = vadd.f32 %v235_v4, %v1261_v36  ;;  %v236_v25 = vrot.slane %v1287_v38, 1  ;;  %812 = vst [vmem:[%s1515_s3 + $0x87] sm:$0xff] %v764_v19  ;;  %v592_v29 = vmul.f32 9.0, %v1220_v27 }
  0x4e   :  { %v766_v28 = vsub.f32 %v589_v60, %v670_v20  ;;  %v399_v30 = vrot.slane %v1287_v38, 2  ;;  %v519_v57 = vadd.f32 %v485_v17, %v483_v52  ;;  %v593_v26 = vmul.f32 9.0, %v1230_v31  ;;  %v1327_v31 = vld [vmem:[%s1514_s0 + $0x148] sm:$0x3] }
  0x4f   :  { %v671_v33 = vrot.slane %v549_v21, 7  ;;  %v486_v34 = vadd.f32 %v398_v8, %v323_v22  ;;  %v237_v35 = vsel %vm172_vm0, %v234_v14, %v236_v25  ;;  %v238_v41 = vrot.slane %v1301_v7, 1  ;;  %v1380_v8 = vld [vmem:[%s1514_s0 + $0x168] sm:$0xff]  ;;  %v1390_v25 = vld [vmem:[%s1514_s0 + $0x170] sm:$0xff] }
  0x50   :  { %814 = vst [vmem:[%s1515_s3 + $0x8f] sm:$0xfe] %v766_v28  ;;  %v324_v39 = vadd.f32 %v237_v35, %v1271_v62  ;;  %v400_v40 = vsel %vm335_vm1, %v397_v15, %v399_v30  ;;  %v239_v27 = vrot.slane %v1306_v5, 1  ;;  %v401_v45 = vrot.slane %v1301_v7, 2 }
  0x51   :  { %v672_v42 = vsel %vm642_vm2, %v670_v20, %v671_v33  ;;  %v768_v43 = vsub.f32 %v591_v18, %v671_v33  ;;  %v550_v44 = vadd.f32 %v518_v24, %v486_v34  ;;  %v402_v49 = vrot.slane %v1306_v5, 2 }
  0x52   :  { %v767_v13 = vsub.f32 %v590_v6, %v672_v42  ;;  %v487_v32 = vadd.f32 %v400_v40, %v324_v39  ;;  %v240_v46 = vsel %vm172_vm0, %v238_v41, %v239_v27  ;;  %v594_v51 = vmul.f32 9.0, %v1246_v23  ;;  %v1350_v23 = vld [vmem:[%s1514_s0 + $0x158] sm:$0xff] }
  0x53   :  { %816 = vst [vmem:[%s1515_s3 + $0x9f] sm:$0x1] %v768_v43  ;;  %v673_v50 = vrot.slane %v550_v44, 7  ;;  %v325_v37 = vadd.f32 %v240_v46, %v1301_v7  ;;  %v520_v52 = vadd.f32 %v486_v34, %v484_v0  ;;  %v403_v48 = vsel %vm335_vm1, %v401_v45, %v402_v49 }
  0x54   :  { %815 = vst [vmem:[%s1515_s3 + $0x97] sm:$0xff] %v767_v13  ;;  %v551_v47 = vadd.f32 %v519_v57, %v487_v32  ;;  %v241_v53 = vrot.slane %v1327_v31, 1  ;;  %v404_v54 = vrot.slane %v1327_v31, 2  ;;  %v595_v60 = vmul.f32 9.0, %v1261_v36 }
  0x55   :  { %v769_v58 = vsub.f32 %v592_v29, %v673_v50  ;;  %v488_v59 = vadd.f32 %v403_v48, %v325_v37  ;;  %v521_v61 = vadd.f32 %v487_v32, %v485_v17  ;;  %v596_v6 = vmul.f32 9.0, %v1271_v62  ;;  %v1368_v62 = vld [vmem:[%s1514_s0 + $0x160] sm:$0x3] }
  0x56   :  { %v674_v0 = vrot.slane %v551_v47, 7  ;;  %v242_v1 = vsel %vm172_vm0, %v239_v27, %v241_v53  ;;  %v405_v2 = vsel %vm335_vm1, %v402_v49, %v404_v54  ;;  %v243_v10 = vrot.slane %v1345_v56, 1  ;;  %v1431_v54 = vld [vmem:[%s1516_s1 + $0x188] sm:$0xff] }
  0x57   :  { %817 = vst [vmem:[%s1515_s3 + $0x9f] sm:$0xfe] %v769_v58  ;;  %v552_v9 = vadd.f32 %v520_v52, %v488_v59  ;;  %v326_v63 = vadd.f32 %v242_v1, %v1306_v5  ;;  %v244_v11 = vrot.slane %v1350_v23, 1  ;;  %v406_v14 = vrot.slane %v1345_v56, 2 }
  0x58   :  { %v675_v36 = vsel %vm642_vm2, %v673_v50, %v674_v0  ;;  %v771_v12 = vsub.f32 %v594_v51, %v674_v0  ;;  %v407_v3 = vrot.slane %v1350_v23, 2  ;;  %v597_v18 = vmul.f32 9.0, %v1287_v38 }
  0x59   :  { %v770_v15 = vsub.f32 %v593_v26, %v675_v36  ;;  %v676_v16 = vrot.slane %v552_v9, 7  ;;  %v489_v55 = vadd.f32 %v405_v2, %v326_v63  ;;  %v245_v17 = vsel %vm172_vm0, %v243_v10, %v244_v11  ;;  %v1444_v9 = vld [vmem:[%s1516_s1 + $0x190] sm:$0x3] }
  0x5a   :  { %819 = vst [vmem:[%s1515_s3 + $0xaf] sm:$0x1] %v771_v12  ;;  %v327_v19 = vadd.f32 %v245_v17, %v1345_v56  ;;  %v408_v20 = vsel %vm335_vm1, %v406_v14, %v407_v3  ;;  %v522_v4 = vadd.f32 %v488_v59, %v486_v34  ;;  %v246_v24 = vrot.slane %v1368_v62, 1 }
  0x5b   :  { %818 = vst [vmem:[%s1515_s3 + $0xa7] sm:$0xff] %v770_v15  ;;  %v772_v21 = vsub.f32 %v595_v60, %v676_v16  ;;  %v553_v22 = vadd.f32 %v521_v61, %v489_v55  ;;  %v409_v38 = vrot.slane %v1368_v62, 2  ;;  %v598_v29 = vmul.f32 9.0, %v1301_v7 }
  0x5c   :  { %v490_v28 = vadd.f32 %v408_v20, %v327_v19  ;;  %v523_v30 = vadd.f32 %v489_v55, %v487_v32  ;;  %v599_v57 = vmul.f32 9.0, %v1306_v5  ;;  %v247_v34 = vsel %vm172_vm0, %v244_v11, %v246_v24  ;;  %v1406_v5 = vld [vmem:[%s1514_s0 + $0x178] sm:$0x3] }
  0x5d   :  { %820 = vst [vmem:[%s1515_s3 + $0xaf] sm:$0xfe] %v772_v21  ;;  %v677_v33 = vrot.slane %v553_v22, 7  ;;  %v410_v35 = vsel %vm335_vm1, %v407_v3, %v409_v38  ;;  %v248_v26 = vrot.slane %v1380_v8, 1  ;;  %v328_v40 = vadd.f32 %v247_v34, %v1350_v23 }
  0x5e   :  { %v554_v39 = vadd.f32 %v522_v4, %v490_v28  ;;  %v249_v41 = vrot.slane %v1390_v25, 1  ;;  %v411_v7 = vrot.slane %v1380_v8, 2  ;;  %v600_v43 = vmul.f32 9.0, %v1327_v31  ;;  %v1421_v31 = vld [vmem:[%s1516_s1 + $0x180] sm:$0xff] }
  0x5f   :  { %v678_v27 = vsel %vm642_vm2, %v676_v16, %v677_v33  ;;  %v774_v42 = vsub.f32 %v597_v18, %v677_v33  ;;  %v412_v44 = vrot.slane %v1390_v25, 2  ;;  %v491_v32 = vadd.f32 %v410_v35, %v328_v40  ;;  %v855_v4 = vld [vmem:[%s1517_s2 + $0x1a0] sm:$0xff] }
  0x60   :  { %v773_v45 = vsub.f32 %v596_v6, %v678_v27  ;;  %v679_v13 = vrot.slane %v554_v39, 7  ;;  %v250_v46 = vsel %vm172_vm0, %v248_v26, %v249_v41  ;;  %v524_v51 = vadd.f32 %v490_v28, %v488_v59 }
  0x61   :  { %822 = vst [vmem:[%s1515_s3 + $0xbf] sm:$0x1] %v774_v42  ;;  %v329_v49 = vadd.f32 %v250_v46, %v1380_v8  ;;  %v413_v50 = vsel %vm335_vm1, %v411_v7, %v412_v44  ;;  %v251_v37 = vrot.slane %v1406_v5, 1  ;;  %v555_v47 = vadd.f32 %v523_v30, %v491_v32 }
  0x62   :  { %821 = vst [vmem:[%s1515_s3 + $0xb7] sm:$0xff] %v773_v45  ;;  %v775_v52 = vsub.f32 %v598_v29, %v679_v13  ;;  %v601_v48 = vmul.f32 9.0, %v1345_v56  ;;  %v414_v53 = vrot.slane %v1406_v5, 2  ;;  %v525_v60 = vadd.f32 %v491_v32, %v489_v55 }
  0x63   :  { %v492_v58 = vadd.f32 %v413_v50, %v329_v49  ;;  %v252_v59 = vsel %vm172_vm0, %v249_v41, %v251_v37  ;;  %v602_v61 = vmul.f32 9.0, %v1350_v23  ;;  %v680_v0 = vrot.slane %v555_v47, 7 }
  0x64   :  { %823 = vst [vmem:[%s1515_s3 + $0xbf] sm:$0xfe] %v775_v52  ;;  %v330_v56 = vadd.f32 %v252_v59, %v1390_v25  ;;  %v415_v1 = vsel %vm335_vm1, %v412_v44, %v414_v53  ;;  %v253_v2 = vrot.slane %v1421_v31, 1  ;;  %v254_v63 = vrot.slane %v1431_v54, 1 }
  0x65   :  { %v556_v6 = vadd.f32 %v524_v51, %v492_v58  ;;  %v416_v23 = vrot.slane %v1421_v31, 2  ;;  %v417_v10 = vrot.slane %v1431_v54, 2  ;;  %v681_v11 = vsel %vm642_vm2, %v679_v13, %v680_v0 }
  0x66   :  { %v777_v36 = vsub.f32 %v600_v43, %v680_v0  ;;  %v493_v12 = vadd.f32 %v415_v1, %v330_v56  ;;  %v603_v14 = vmul.f32 9.0, %v1368_v62  ;;  %v776_v3 = vsub.f32 %v599_v57, %v681_v11  ;;  %v854_v62 = vld [vmem:[%s1517_s2 + $0x198] sm:$0xff] }
  0x67   :  { %v682_v15 = vrot.slane %v556_v6, 7  ;;  %v255_v16 = vsel %vm172_vm0, %v253_v2, %v254_v63  ;;  %v418_v55 = vsel %vm335_vm1, %v416_v23, %v417_v10  ;;  %v526_v19 = vadd.f32 %v492_v58, %v490_v28  ;;  %v856_v28 = vld [vmem:[%s1517_s2 + $0x1a8] sm:$0x3] }
  0x68   :  { %825 = vst [vmem:[%s1515_s3 + $0xcf] sm:$0x1] %v777_v36  ;;  %v557_v17 = vadd.f32 %v525_v60, %v493_v12  ;;  %v331_v18 = vadd.f32 %v1421_v31, %v255_v16  ;;  %v256_v20 = vrot.slane %v1444_v9, 1  ;;  %824 = vst [vmem:[%s1515_s3 + $0xc7] sm:$0xff] %v776_v3  ;;  %v604_v22 = vmul.f32 9.0, %v1380_v8 }
  0x69   :  { %v778_v21 = vsub.f32 %v601_v48, %v682_v15  ;;  %v419_v24 = vrot.slane %v1444_v9, 2  ;;  %v527_v38 = vadd.f32 %v493_v12, %v491_v32  ;;  %v605_v33 = vmul.f32 9.0, %v1390_v25 }
  0x6a   :  { %v683_v29 = vrot.slane %v557_v17, 7  ;;  %v494_v30 = vadd.f32 %v418_v55, %v331_v18  ;;  %v257_v57 = vsel %vm172_vm0, %v254_v63, %v256_v20  ;;  %v258_v35 = vrot.slane %v854_v62, 1 }
  0x6b   :  { %826 = vst [vmem:[%s1515_s3 + $0xcf] sm:$0xfe] %v778_v21  ;;  %v332_v34 = vadd.f32 %v1431_v54, %v257_v57  ;;  %v420_v8 = vsel %vm335_vm1, %v417_v10, %v419_v24  ;;  %v259_v26 = vrot.slane %v855_v4, 1  ;;  %v261_v7 = vrot.slane %v856_v28, 1 }
  0x6c   :  { %v684_v39 = vsel %vm642_vm2, %v682_v15, %v683_v29  ;;  %v780_v40 = vsub.f32 %v603_v14, %v683_v29  ;;  %v558_v41 = vadd.f32 %v526_v19, %v494_v30  ;;  %v421_v25 = vrot.slane %v854_v62, 2 }
  0x6d   :  { %v779_v27 = vsub.f32 %v602_v61, %v684_v39  ;;  %v495_v42 = vadd.f32 %v420_v8, %v332_v34  ;;  %v260_v43 = vsel %vm172_vm0, %v258_v35, %v259_v26  ;;  %v606_v45 = vmul.f32 9.0, %v1406_v5 }
  0x6e   :  { %828 = vst [vmem:[%s1515_s3 + $0xdf] sm:$0x1] %v780_v40  ;;  %v685_v44 = vrot.slane %v558_v41, 7  ;;  %v333_v13 = vadd.f32 %v854_v62, %v260_v43  ;;  %v422_v32 = vrot.slane %v855_v4, 2  ;;  %v528_v49 = vadd.f32 %v494_v30, %v492_v58 }
  0x6f   :  { %827 = vst [vmem:[%s1515_s3 + $0xd7] sm:$0xff] %v779_v27  ;;  %v559_v46 = vadd.f32 %v527_v38, %v495_v42  ;;  %v262_v50 = vsel %vm172_vm0, %v259_v26, %v261_v7  ;;  %v424_v51 = vrot.slane %v856_v28, 2  ;;  %v529_v48 = vadd.f32 %v495_v42, %v493_v12 }
  0x70   :  { %v781_v37 = vsub.f32 %v604_v22, %v685_v44  ;;  %v423_v52 = vsel %vm335_vm1, %v421_v25, %v422_v32  ;;  %v334_v47 = vadd.f32 %v855_v4, %v262_v50  ;;  %v607_v56 = vmul.f32 9.0, %v1421_v31 }
  0x71   :  { %v686_v53 = vrot.slane %v559_v46, 7  ;;  %v496_v59 = vadd.f32 %v423_v52, %v333_v13  ;;  %v425_v5 = vsel %vm335_vm1, %v422_v32, %v424_v51  ;;  %v609_v6 = vmul.f32 9.0, %v1444_v9 }
  0x72   :  { %829 = vst [vmem:[%s1515_s3 + $0xdf] sm:$0xfe] %v781_v37  ;;  %v497_v60 = vadd.f32 %v425_v5, %v334_v47  ;;  %v608_v23 = vmul.f32 9.0, %v1431_v54 }
  0x73   :  { %v687_v61 = vsel %vm642_vm2, %v685_v44, %v686_v53  ;;  %v783_v58 = vsub.f32 %v606_v45, %v686_v53  ;;  %v560_v0 = vadd.f32 %v528_v49, %v496_v59 }
  0x74   :  { %v782_v1 = vsub.f32 %v605_v33, %v687_v61  ;;  %v561_v2 = vadd.f32 %v529_v48, %v497_v60 }
  0x75   :  { %831 = vst [vmem:[%s1515_s3 + $0xef] sm:$0x1] %v783_v58  ;;  %v688_v63 = vrot.slane %v560_v0, 7 }
  0x76   :  { %830 = vst [vmem:[%s1515_s3 + $0xe7] sm:$0xff] %v782_v1  ;;  %v689_v10 = vrot.slane %v561_v2, 7 }
  0x77   :  { %v784_v11 = vsub.f32 %v607_v56, %v688_v63 }
  0x78   :  { %v690_v36 = vsel %vm642_vm2, %v688_v63, %v689_v10  ;;  %v786_v31 = vsub.f32 %v609_v6, %v689_v10 }
  0x79   :  { %832 = vst [vmem:[%s1515_s3 + $0xef] sm:$0xfe] %v784_v11  ;;  %v785_v9 = vsub.f32 %v608_v23, %v690_v36 }
  0x7a   :  { %834 = vst [vmem:[%s1515_s3 + $0xff] sm:$0x1] %v786_v31 }
  0x7b   :  { %833 = vst [vmem:[%s1515_s3 + $0xf7] sm:$0xff] %v785_v9 }

</bundles_post_ra>
